<compile_context>
chip_gen: v7x
topology: tpu7x:2x2x1
jax: 0.10.0
libtpu: 0.0.40
codegen_flags: <defaults>
</compile_context>

<pallas_src>
import jax
import jax.numpy as jnp
from jax.experimental import pallas as pl
from jax.experimental.pallas import tpu as pltpu


# ----------------------------- kernels ------------------------------------ #

def _drop_path_kernel(x_ref, scale_ref, o_ref):
    # x_ref:     (tb, tf) in input dtype
    # scale_ref: (tb, 1)  per-sample scale (0 or 1/keep_prob), already in x dtype
    o_ref[...] = x_ref[...] * scale_ref[...]


def _drop_path_add_kernel(x_ref, scale_ref, res_ref, o_ref):
    # Fused residual: out = residual + x * scale (single streaming pass).
    o_ref[...] = res_ref[...] + x_ref[...] * scale_ref[...]


# --------------------------- tiling helpers -------------------------------- #

def _sublane_multiple(dtype):
    # Native sublane packing: 8 rows/vreg for 4-byte, 16 for 2-byte, 32 for 1-byte.
    return {4: 8, 2: 16, 1: 32}.get(jnp.dtype(dtype).itemsize, 8)


def _round_down(v, m):
    return max(m, (v // m) * m)


def _choose_tiles(batch, feat, itemsize, sublane, tile_bytes):
    """Pick a (tb, tf) tile that fits `tile_bytes` and is lane/sublane aligned."""
    # Feature tile: full feature axis when it fits, else a multiple of 128 lanes.
    if feat * itemsize <= tile_bytes:
        tf = feat
    else:
        tf = min(_round_down(tile_bytes // (sublane * itemsize), 128), feat)

    # Batch tile: as many samples as fit, rounded to the sublane multiple.
    tb = max(1, tile_bytes // max(1, tf * itemsize))
    if tb >= batch:
        tb = batch
    else:
        tb = min(_round_down(tb, sublane), batch)

    # Guarantee >= 2 grid steps for non-trivial sizes so both v7x TensorCores
    # get work and DMA/compute pipelining has something to overlap.
    total_bytes = batch * feat * itemsize
    steps = pl.cdiv(batch, tb) * pl.cdiv(feat, tf)
    if total_bytes > (2 << 20) and steps < 2:
        if batch >= 2 * sublane:
            tb = _round_down(pl.cdiv(batch, 2), sublane)
        elif feat >= 2 * 128:
            tf = _round_down(pl.cdiv(feat, 2), 128)
    return tb, tf


def _drop_path_call(x2, scale, residual2=None):
    batch, feat = x2.shape
    itemsize = jnp.dtype(x2.dtype).itemsize
    sublane = _sublane_multiple(x2.dtype)

    # in + out (and optionally residual) tiles are each double-buffered by the
    # pipeline; keep the live set well under the 48 MiB scoped limit, which is
    # itself under v7x's 64 MiB physical VMEM (v5e/v6e have 128 MiB).
    tile_bytes = (5 << 20) if residual2 is not None else (8 << 20)
    tb, tf = _choose_tiles(batch, feat, itemsize, sublane, tile_bytes)

    grid = (pl.cdiv(batch, tb), pl.cdiv(feat, tf))
    x_spec = pl.BlockSpec((tb, tf), lambda i, j: (i, j))
    s_spec = pl.BlockSpec((tb, 1), lambda i, j: (i, 0))

    if residual2 is None:
        kernel, in_specs, args = _drop_path_kernel, [x_spec, s_spec], (x2, scale)
    else:
        kernel = _drop_path_add_kernel
        in_specs = [x_spec, s_spec, x_spec]
        args = (x2, scale, residual2)

    return pl.pallas_call(
        kernel,
        out_shape=jax.ShapeDtypeStruct((batch, feat), x2.dtype),
        grid=grid,
        in_specs=in_specs,
        out_specs=x_spec,
        compiler_params=pltpu.CompilerParams(
            dimension_semantics=("parallel", "parallel"),
            vmem_limit_bytes=48 * 1024 * 1024,
        ),
    )(*args)


# ----------------------------- public API ---------------------------------- #

def _make_scale(x, drop_prob, key):
    keep_prob = 1.0 - float(drop_prob)
    B = x.shape[0]
    # Matches torch: floor(keep_prob + U[0,1)) -> {0,1}, then scale by 1/keep_prob.
    u = jax.random.uniform(key, (B,), dtype=jnp.float32)
    keep = jnp.floor(jnp.float32(keep_prob) + u)
    # Deliberate choice: scale lives in x.dtype (same as torch, which multiplies
    # in x.dtype); avoids a per-tile f32 cast / sublane repack in the kernel.
    return (keep / jnp.float32(keep_prob)).astype(x.dtype).reshape(B, 1)


def drop_path(x, drop_prob: float = 0.0, training: bool = False,
              key=None, seed: int = 0):
    """JAX/Pallas equivalent of TransReID drop_path()."""
    if drop_prob == 0.0 or not training:
        return x
    if key is None:
        # NOTE: a fixed default key repeats the same mask every call; pass a
        # fresh `key` per layer / per step in real training.
        key = jax.random.PRNGKey(seed)
    scale = _make_scale(x, drop_prob, key)
    x2 = x.reshape(x.shape[0], -1)          # lane-dense (B, N*D) slab
    out = _drop_path_call(x2, scale)
    return out.reshape(x.shape)


def drop_path_add(residual, x, drop_prob: float = 0.0, training: bool = False,
                  key=None, seed: int = 0):
    """Fused `residual + drop_path(x)` — one HBM pass over the activations."""
    if drop_prob == 0.0 or not training:
        return residual + x
    if key is None:
        key = jax.random.PRNGKey(seed)
    scale = _make_scale(x, drop_prob, key)
    B = x.shape[0]
    out = _drop_path_call(x.reshape(B, -1), scale, residual.reshape(B, -1))
    return out.reshape(x.shape)


class DropPath:
    """Drop paths (Stochastic Depth) per sample — JAX/Pallas port."""

    def __init__(self, drop_prob=None):
        self.drop_prob = drop_prob if drop_prob is not None else 0.0
        self.training = True

    def __call__(self, x, key=None, seed: int = 0):
        return drop_path(x, self.drop_prob, self.training, key=key, seed=seed)


# ------------------------------ self-test ----------------------------------- #

if __name__ == "__main__":
    key = jax.random.PRNGKey(0)
    kx, kr, kd = jax.random.split(key, 3)

    B, N, D = 2, 8, 32
    x = jax.random.normal(kx, (B, N, D), dtype=jnp.float32)

    drop_prob = 0.3
    keep_prob = 1.0 - drop_prob

    module = DropPath(drop_prob=drop_prob)
    module.training = True
    out = jax.block_until_ready(module(x, key=kd))

    # Each sample is either all-zeros or x / keep_prob.
    for b in range(B):
        sample = out[b]
        is_zero = bool(jnp.all(sample == 0.0))
        is_scaled = bool(jnp.allclose(sample, x[b] / keep_prob,
                                      atol=1e-5, rtol=1e-5))
        assert is_zero or is_scaled, \
            "DropPath output is neither dropped nor scaled"

    # Fused residual variant matches residual + drop_path(x).
    res = jax.random.normal(kr, (B, N, D), dtype=jnp.float32)
    fused = jax.block_until_ready(
        drop_path_add(res, x, drop_prob, training=True, key=kd))
    ref = res + drop_path(x, drop_prob, training=True, key=kd)
    assert bool(jnp.allclose(fused, ref, atol=1e-5, rtol=1e-5))

    # bf16 path: exercises dtype-native scale and sublane rounding.
    Bb, Nb, Db = 16, 8, 128
    xb = jax.random.normal(kx, (Bb, Nb, Db), dtype=jnp.bfloat16)
    outb = jax.block_until_ready(drop_path(xb, drop_prob, training=True, key=kd))
    scale_bf16 = float(jnp.asarray(1.0 / keep_prob, dtype=jnp.bfloat16))
    for b in range(Bb):
        sample = outb[b].astype(jnp.float32)
        expect = xb[b].astype(jnp.float32) * scale_bf16
        is_zero = bool(jnp.all(sample == 0.0))
        is_scaled = bool(jnp.allclose(sample, expect, atol=2e-2, rtol=2e-2))
        assert is_zero or is_scaled

    # Eval / drop_prob==0 path is identity.
    module.training = False
    out_eval = jax.block_until_ready(module(x))
    assert bool(jnp.array_equal(out_eval, x))

    print("KERNEL_OK")
</pallas_src>

<mosaic_0001>
module attributes {stable_mosaic.version = 11 : i64} {
  func.func @_drop_path_kernel(%arg0: i32, %arg1: i32, %arg2: memref<2x256xf32, #tpu.memory_space<vmem>>, %arg3: memref<2x1xf32, #tpu.memory_space<vmem>>, %arg4: memref<2x256xf32, #tpu.memory_space<vmem>>) attributes {dimension_semantics = [#tpu.dimension_semantics<parallel>, #tpu.dimension_semantics<parallel>], iteration_bounds = array<i64: 1, 1>, scalar_prefetch = 0 : i64, scratch_operands = 0 : i64, tpu.core_type = #tpu.core_type<tc>, window_params = [{transform_indices = @transform_0, window_bounds = array<i64: 2, 256>}, {transform_indices = @transform_1, window_bounds = array<i64: 2, 1>}, {transform_indices = @transform_2, window_bounds = array<i64: 2, 256>}]} {
    %c0 = arith.constant 0 : index
    %c0_0 = arith.constant 0 : index
    %0 = vector.load %arg2[%c0, %c0_0] : memref<2x256xf32, #tpu.memory_space<vmem>>, vector<2x256xf32>
    %c0_1 = arith.constant 0 : index
    %c0_2 = arith.constant 0 : index
    %1 = vector.load %arg3[%c0_1, %c0_2] : memref<2x1xf32, #tpu.memory_space<vmem>>, vector<2x1xf32>
    %2 = vector.broadcast %1 : vector<2x1xf32> to vector<2x256xf32>
    %3 = arith.mulf %0, %2 : vector<2x256xf32>
    %c0_3 = arith.constant 0 : index
    %c0_4 = arith.constant 0 : index
    %4 = vector.load %arg4[%c0_3, %c0_4] : memref<2x256xf32, #tpu.memory_space<vmem>>, vector<2x256xf32>
    tpu.vector_store %arg4[%c0_3, %c0_4], %3 {strides = array<i32>} : memref<2x256xf32, #tpu.memory_space<vmem>>, vector<2x256xf32>,
    return
  }
  func.func @transform_0(%arg0: i32, %arg1: i32) -> (i32, i32) {
    %c0_i32 = arith.constant 0 : i32
    return %arg0, %arg1 : i32, i32
  }
  func.func @transform_1(%arg0: i32, %arg1: i32) -> (i32, i32) {
    %c0_i32 = arith.constant 0 : i32
    %c0_i32_0 = arith.constant 0 : i32
    return %arg0, %c0_i32 : i32, i32
  }
  func.func @transform_2(%arg0: i32, %arg1: i32) -> (i32, i32) {
    %c0_i32 = arith.constant 0 : i32
    return %arg0, %arg1 : i32, i32
  }
}

</mosaic_0001>

<bundles_post_ra>
// kernel: tpu_custom_call.1
= control target key start
LH: loop header
LB: loop body
LE: loop exit
PB: predicated region body
PF: predicated region fallthrough
CT: control target
= control target key end

     0   :  { %7 = vsyncpa [#allocation3], 0  ;;  %s154_s0 = inlined_call_operand.hbm [shape: f32[2,256], index: 0, kind: input, shape index: {}]   ;;  %s155_s1 = inlined_call_operand.vmem [shape: f32[2,1], index: 1, kind: input, shape index: {}]   ;;  %s156_s2 = inlined_call_operand.hbm [shape: f32[2,256], index: 2, kind: output, shape index: {}]  }
   0x1   :  { %8 = vsyncpa [#allocation4], 0  ;;  %s108_s9 = smov [#allocation2]   ;;  %s60_s13 = scalar_lea.hbm %s154_s0, 64 }
   0x2   :  { %s15_s10 = sshll.u32 %s108_s9, 4  ;;  %p61_p0 = scmp.ne.s32.totalorder %s154_s0, %s60_s13  ;;  %s16_s10 = int_to_ptr.vmem [resolvable:$true] %s15_s10 }
   0x3   :  { %p64_p1 = scmp.lt.u32.totalorder %s60_s13, %s154_s0 }
   0x5   :  { %p66_p2 = pnand %p64_p1, %p61_p0 }
   0x7   :  { %69 = shalt.err (!%p66_p2)
}
   0x8   :  { %s70_s18 = scalar_lea.vmem %s16_s10, 64  ;;  %p75_p4 = scmp.lt.s32.totalorder %s16_s10, %s16_s10 }
   0x9   :  { %p71_p3 = scmp.ne.s32.totalorder %s16_s10, %s70_s18  ;;  %p76_p5 = scmp.lt.s32.totalorder %s70_s18, %s70_s18 }
   0xb   :  { %p77_p6 = por %p76_p5, %p75_p4 }
   0xd   :  { %p78_p7 = pnand %p77_p6, %p71_p3 }
   0xf   :  { %81 = shalt.err (!%p78_p7)
}
  0x10   :  { %18 = dma.hbm_to_vmem [thread:$0]  %s154_s0, 64, %s16_s10, [#allocation3]  }
  0x11   :  { %104 = dma.done.wait [#allocation3], 64  }
  0x12   :  { %105 = vsyncadd [#allocation3], 4294967232  ;;  %v109_v0 = vmov 0   ;;  %v25_v1 = vld [vmem:[%s155_s1] sm:$0x3]  ;;  %v33_v4 = vlaneseq  ;;  %s111_s23 = smov [#allocation5]  }
  0x13   :  { %59 = vset.pattern.permute.xlu0 %v109_v0  ;;  %v110_v2 = vmov 269488144   ;;  %v24_v9 = vld [vmem:[#allocation2] sm:$0xf]  ;;  %s46_s24 = sshll.u32 %s111_s23, 4  ;;  %s47_s24 = int_to_ptr.vmem [resolvable:$true] %s46_s24 }
  0x14   :  { %28 = vperm.xlu0 %59, %v25_v1   ;;  %v31_v3 = vunpack.c.l.s4 %v110_v2  ;;  %v34_v6 = vshrl.u32 %v33_v4, 7  ;;  %s82_s0 = scalar_lea.vmem %s47_s24, 64  ;;  %p87_p9 = scmp.lt.s32.totalorder %s47_s24, %s47_s24 }
  0x15   :  { %p83_p8 = scmp.ne.s32.totalorder %s47_s24, %s82_s0  ;;  %p88_p10 = scmp.lt.s32.totalorder %s82_s0, %s82_s0 }
  0x16   :  { %v32_v5 = vunpack.c.0.s8 %v31_v3 }
  0x17   :  { %p89_p11 = por %p88_p10, %p87_p9 }
  0x18   :  { %v35_v7 = vsub.s32 %v32_v5, %v34_v6 }
  0x19   :  { %p90_p12 = pnand %p89_p11, %p83_p8 }
  0x93   :  { %v29_v8 = vpop.permute.xlu0 %28 }
  0x94   :  { %v36_v10 = vrot.slane %v29_v8, %v35_v7 }
  0x96   :  { %v38_v11 = vmul.f32 %v36_v10, %v24_v9 }
  0x98   :  { %39 = vst [vmem:[#allocation5] sm:$0xf] %v38_v11 }
  0x99   :  { %93 = shalt.err (!%p90_p12)
}
  0x9a   :  { %s94_s26 = scalar_lea.hbm %s156_s2, 64 }
  0x9b   :  { %p95_p13 = scmp.ne.s32.totalorder %s156_s2, %s94_s26  ;;  %p98_p0 = scmp.lt.u32.totalorder %s94_s26, %s156_s2 }
  0x9d   :  { %p100_p1 = pnand %p98_p0, %p95_p13 }
  0x9f   :  { %103 = shalt.err (!%p100_p1)
}
  0xa0   :  { %49 = dma.vmem_to_hbm [thread:$0]  %s47_s24, 64, %s156_s2, [#allocation4]  }
  0xa1   :  { %106 = dma.done.wait [#allocation4], 64  }
  0xa2   :  { %107 = vsyncadd [#allocation4], 4294967232 }
  0xa3   :  { %53 = vsyncpa [#allocation3], 1 }
  0xa4   :  { %54 = vsyncpa [#allocation4], 1 }

</bundles_post_ra>
